<compile_context>
chip_gen: v7x
topology: tpu7x:2x2x1
jax: 0.10.0
libtpu: 0.0.40
codegen_flags: <defaults>
</compile_context>

<pallas_src>
import jax
import jax.numpy as jnp
from jax.experimental import pallas as pl
from jax.experimental.pallas import tpu as pltpu


def _round_up(x, m):
    return (x + m - 1) // m * m


def _vmem_limit(bytes_needed):
    # 1.5x headroom + 2 MiB, floor 16 MiB, cap at v7x's 64 MiB physical VMEM.
    return int(min(max(int(bytes_needed * 1.5) + (2 << 20), 16 << 20), 64 << 20))


def _choose_tm(batch, tm_max=512):
    """Batch tile: big enough to amortize per-step overhead / fill the MXU M dim,
    but small enough that the 'parallel' grid has >= 2 steps (v7x megacore)."""
    b8 = _round_up(batch, 8)
    if b8 <= 128:
        return b8                               # one small sublane-aligned tile
    n128 = pl.cdiv(b8, 128)
    tm = 128 * max(1, n128 // 2)                # >= 2 grid steps when batch allows
    return int(min(tm, _round_up(tm_max, 128)))


# ----------------------------------------------------------------------------- kernels

def _make_resident_kernel(k_pad, n_pad):
    """Unrolled L-layer kernel; per-layer 128-aligned static slices of the slab."""
    n_layers = len(k_pad)

    def kernel(x_ref, w_ref, b_ref, out_ref):
        # x_ref: (TM, K0) bf16 | w_ref: (L, P, P) bf16 | b_ref: (L, 1, P) f32
        # out_ref: (TM, P_out) f32
        h = x_ref[...]                                           # bf16
        for i in range(n_layers):                                # static unroll
            k, n = k_pad[i], n_pad[i]
            acc = jnp.dot(h, w_ref[i, :k, :n],
                          preferred_element_type=jnp.float32)    # MXU, f32 accum
            a = jnp.maximum(acc + b_ref[i, :, :n], 0.0)          # f32 bias + ReLU
            if i + 1 < n_layers:
                h = a.astype(jnp.bfloat16)                       # bf16 between layers
            else:
                out_ref[...] = a.astype(out_ref.dtype)
    return kernel


def _stream_kernel(x_ref, w_ref, b_ref, out_ref, h_ref):
    """Layer-streaming kernel: one layer per grid step along axis 1; the activation
    lives in a VMEM scratch across layer steps."""
    # x_ref: (TM, P) bf16 | w_ref: (1, P, P) bf16 | b_ref: (1, 1, P) f32
    # out_ref: (TM, P_out) f32 | h_ref: (TM, P) bf16 scratch
    l = pl.program_id(1)

    @pl.when(l == 0)
    def _():
        h_ref[...] = x_ref[...]

    acc = jnp.dot(h_ref[...], w_ref[0], preferred_element_type=jnp.float32)
    a = jnp.maximum(acc + b_ref[0], 0.0)
    h_ref[...] = a.astype(h_ref.dtype)

    @pl.when(l == pl.num_programs(1) - 1)
    def _():
        out_ref[...] = a[:, :out_ref.shape[1]].astype(out_ref.dtype)


# ----------------------------------------------------------------------------- packing

def pack_params(weights, biases, bn_gamma, bn_beta, bn_mean, bn_var, eps=1e-5):
    """Fold eval-mode BatchNorm into each Linear and pack into lane-dense slabs.

    weights[i]: (out_i, in_i) PyTorch layout; biases[i]: (out_i,).
    Returns {'w_slab': (L,P,P) bf16, 'b_slab': (L,1,P) f32, 'dims': [(in_i, out_i)]}.
    Call once, outside the hot path.
    """
    L = len(weights)
    dims = [(int(w.shape[1]), int(w.shape[0])) for w in weights]
    P = _round_up(max(max(d) for d in dims), 128)
    w_slab = jnp.zeros((L, P, P), jnp.float32)
    b_slab = jnp.zeros((L, 1, P), jnp.float32)
    for i, (w, b, g, bt, mu, var) in enumerate(
            zip(weights, biases, bn_gamma, bn_beta, bn_mean, bn_var)):
        s = jnp.asarray(g, jnp.float32) / jnp.sqrt(jnp.asarray(var, jnp.float32) + eps)
        t = jnp.asarray(bt, jnp.float32) - jnp.asarray(mu, jnp.float32) * s
        wt = jnp.asarray(w, jnp.float32).T * s[None, :]          # (in_i, out_i), BN folded
        bb = jnp.asarray(b, jnp.float32) * s + t
        w_slab = w_slab.at[i, :wt.shape[0], :wt.shape[1]].set(wt)
        b_slab = b_slab.at[i, 0, :bb.shape[0]].set(bb)
    return {"w_slab": w_slab.astype(jnp.bfloat16), "b_slab": b_slab, "dims": dims}


# ----------------------------------------------------------------------------- forward

def mlp_simple_forward(x, params, tm_max=512, force_stream=False,
                       single_buffer_slabs=True, stream_threshold_bytes=24 << 20):
    """x: (..., n_in).  Returns (batch, n_out) f32."""
    w_slab, b_slab, dims = params["w_slab"], params["b_slab"], params["dims"]
    L, P, _ = w_slab.shape
    n_in, n_out = dims[0][0], dims[-1][1]
    k_pad = tuple(_round_up(d_in, 128) for d_in, _ in dims)
    n_pad = tuple(_round_up(d_out, 128) for _, d_out in dims)
    p_out = n_pad[-1]                                            # lane-dense output width

    x2d = jnp.asarray(x, jnp.float32).reshape(-1, n_in)
    B = x2d.shape[0]
    TM = _choose_tm(B, tm_max)
    B_pad = _round_up(B, TM)

    slab_bytes = w_slab.size * 2 + b_slab.size * 4
    stream = force_stream or slab_bytes > stream_threshold_bytes

    if not stream:
        # All-layers-resident path: slabs stay in VMEM across the batch grid.
        K0 = k_pad[0]
        xp = jnp.zeros((B_pad, K0), jnp.bfloat16).at[:B, :n_in].set(
            x2d.astype(jnp.bfloat16))                            # pad + bf16 cast fused
        n_buf = 1 if single_buffer_slabs else 2
        slab_pm = pl.Buffered(n_buf)
        need = n_buf * slab_bytes + 2 * TM * K0 * 2 + 2 * TM * p_out * 4
        out = pl.pallas_call(
            _make_resident_kernel(k_pad, n_pad),
            out_shape=jax.ShapeDtypeStruct((B_pad, p_out), jnp.float32),
            grid=(B_pad // TM,),
            in_specs=[
                pl.BlockSpec((TM, K0), lambda i: (i, 0)),               # x tile, pipelined
                pl.BlockSpec((L, P, P), lambda i: (0, 0, 0),
                             pipeline_mode=slab_pm),                    # resident weights
                pl.BlockSpec((L, 1, P), lambda i: (0, 0, 0),
                             pipeline_mode=slab_pm),                    # resident biases
            ],
            out_specs=pl.BlockSpec((TM, p_out), lambda i: (i, 0)),
            compiler_params=pltpu.CompilerParams(
                dimension_semantics=("parallel",),
                vmem_limit_bytes=_vmem_limit(need)),
        )(xp, w_slab, b_slab)
    else:
        # Layer-streaming path (big slabs / v7x 64 MiB VMEM): one (P,P) weight block
        # per step, double-buffered so the next layer's DMA overlaps this matmul.
        xp = jnp.zeros((B_pad, P), jnp.bfloat16).at[:B, :n_in].set(
            x2d.astype(jnp.bfloat16))
        need = (2 * (P * P * 2 + P * 4) + 2 * TM * P * 2 + 2 * TM * p_out * 4
                + TM * P * 2)
        out = pl.pallas_call(
            _stream_kernel,
            out_shape=jax.ShapeDtypeStruct((B_pad, p_out), jnp.float32),
            grid=(B_pad // TM, L),
            in_specs=[
                pl.BlockSpec((TM, P), lambda i, l: (i, 0)),
                pl.BlockSpec((1, P, P), lambda i, l: (l, 0, 0)),
                pl.BlockSpec((1, 1, P), lambda i, l: (l, 0, 0)),
            ],
            out_specs=pl.BlockSpec((TM, p_out), lambda i, l: (i, 0)),
            scratch_shapes=[pltpu.VMEM((TM, P), jnp.bfloat16)],
            compiler_params=pltpu.CompilerParams(
                dimension_semantics=("parallel", "arbitrary"),
                vmem_limit_bytes=_vmem_limit(need)),
        )(xp, w_slab, b_slab)

    return out[:B, :n_out]


# ----------------------------------------------------------------------------- init / test

def init_params(key, n_in, layer_list, bias_val=1e-4):
    """Matches the module init: W ~ kaiming_normal (fan_in, relu), bias filled with
    bias_val.  BN params are randomized (instead of gamma=1/beta=0/mean=0/var=1)
    so the sanity check exercises the BN fold."""
    dims = [n_in] + list(layer_list)
    weights, biases = [], []
    gammas, betas, means, variances = [], [], [], []
    for i in range(len(layer_list)):
        key, kw, kg, kb, km, kv = jax.random.split(key, 6)
        fan_in, fan_out = dims[i], dims[i + 1]
        std = jnp.sqrt(2.0 / fan_in)
        weights.append(jax.random.normal(kw, (fan_out, fan_in), jnp.float32) * std)
        biases.append(jnp.full((fan_out,), bias_val, jnp.float32))
        gammas.append(1.0 + 0.1 * jax.random.normal(kg, (fan_out,), jnp.float32))
        betas.append(0.1 * jax.random.normal(kb, (fan_out,), jnp.float32))
        means.append(0.1 * jax.random.normal(km, (fan_out,), jnp.float32))
        variances.append(jax.random.uniform(kv, (fan_out,), jnp.float32, 0.5, 1.5))
    return weights, biases, gammas, betas, means, variances


if __name__ == "__main__":
    batch = 16
    n_in = 64
    layer_list = [48, 32, 16]
    eps = 1e-5

    key = jax.random.PRNGKey(0)
    key, xkey = jax.random.split(key)
    x = jax.random.normal(xkey, (batch, n_in), dtype=jnp.float32)

    weights, biases, gammas, betas, means, variances = init_params(key, n_in, layer_list)

    # One-time packing (outside the hot path).
    params = pack_params(weights, biases, gammas, betas, means, variances, eps=eps)

    # Default (resident-slab) path and layer-streaming fallback path.
    out = jax.block_until_ready(mlp_simple_forward(x, params))
    out_stream = jax.block_until_ready(mlp_simple_forward(x, params, force_stream=True))

    # Pure-JAX f32 reference: Linear -> BN(eval) -> ReLU per layer.
    h = x
    for i in range(len(layer_list)):
        h = h @ weights[i].T + biases[i]
        h = gammas[i] * (h - means[i]) / jnp.sqrt(variances[i] + eps) + betas[i]
        h = jnp.maximum(h, 0.0)

    assert out.shape == (batch, layer_list[-1])
    assert out_stream.shape == (batch, layer_list[-1])
    # Loose tolerance: matmul operands are bf16 (f32 accumulation), errors compound over L layers.
    assert jnp.allclose(out, h, atol=5e-2, rtol=5e-2), float(jnp.max(jnp.abs(out - h)))
    assert jnp.allclose(out_stream, h, atol=5e-2, rtol=5e-2), float(
        jnp.max(jnp.abs(out_stream - h)))

    print("KERNEL_OK")
</pallas_src>

<mosaic_0001>
module attributes {stable_mosaic.version = 11 : i64} {
  func.func @kernel(%arg0: i32, %arg1: memref<16x128xbf16, #tpu.memory_space<vmem>>, %arg2: memref<3x128x128xbf16, #tpu.memory_space<vmem>>, %arg3: memref<3x1x128xf32, #tpu.memory_space<vmem>>, %arg4: memref<16x128xf32, #tpu.memory_space<vmem>>) attributes {dimension_semantics = [#tpu.dimension_semantics<parallel>], iteration_bounds = array<i64: 1>, scalar_prefetch = 0 : i64, scratch_operands = 0 : i64, tpu.core_type = #tpu.core_type<tc>, window_params = [{transform_indices = @transform_0, window_bounds = array<i64: 16, 128>}, {pipeline_mode = #tpu.pipeline_mode<synchronous>, transform_indices = @transform_1, window_bounds = array<i64: 3, 128, 128>}, {pipeline_mode = #tpu.pipeline_mode<synchronous>, transform_indices = @transform_2, window_bounds = array<i64: 3, 1, 128>}, {transform_indices = @transform_3, window_bounds = array<i64: 16, 128>}]} {
    %c0 = arith.constant 0 : index
    %c0_0 = arith.constant 0 : index
    %0 = vector.load %arg1[%c0, %c0_0] : memref<16x128xbf16, #tpu.memory_space<vmem>>, vector<16x128xbf16>
    %c0_1 = arith.constant 0 : index
    %c0_2 = arith.constant 0 : index
    %c0_3 = arith.constant 0 : index
    %1 = vector.load %arg2[%c0_1, %c0_2, %c0_3] : memref<3x128x128xbf16, #tpu.memory_space<vmem>>, vector<1x128x128xbf16>
    %2 = vector.shape_cast %1 : vector<1x128x128xbf16> to vector<128x128xbf16>
    %cst = arith.constant dense<0.000000e+00> : vector<16x128xf32>
    %3 = tpu.matmul %0, %2, %cst {dimension_numbers = #tpu.dot_dimension_numbers<[1], [0], [0], [1], [0, 0, 1, 1], [], []>} : vector<16x128xbf16>, vector<128x128xbf16>, vector<16x128xf32> -> vector<16x128xf32>
    %c0_4 = arith.constant 0 : index
    %c0_5 = arith.constant 0 : index
    %c0_6 = arith.constant 0 : index
    %4 = vector.load %arg3[%c0_4, %c0_5, %c0_6] : memref<3x1x128xf32, #tpu.memory_space<vmem>>, vector<1x1x128xf32>
    %5 = vector.shape_cast %4 : vector<1x1x128xf32> to vector<1x128xf32>
    %6 = vector.broadcast %5 : vector<1x128xf32> to vector<16x128xf32>
    %7 = arith.addf %3, %6 : vector<16x128xf32>
    %cst_7 = arith.constant 0.000000e+00 : f32
    %8 = vector.broadcast %cst_7 : f32 to vector<16x128xf32>
    %9 = arith.maximumf %7, %8 : vector<16x128xf32>
    %10 = arith.truncf %9 : vector<16x128xf32> to vector<16x128xbf16>
    %c1 = arith.constant 1 : index
    %c0_8 = arith.constant 0 : index
    %c0_9 = arith.constant 0 : index
    %11 = vector.load %arg2[%c1, %c0_8, %c0_9] : memref<3x128x128xbf16, #tpu.memory_space<vmem>>, vector<1x128x128xbf16>
    %12 = vector.shape_cast %11 : vector<1x128x128xbf16> to vector<128x128xbf16>
    %cst_10 = arith.constant dense<0.000000e+00> : vector<16x128xf32>
    %13 = tpu.matmul %10, %12, %cst_10 {dimension_numbers = #tpu.dot_dimension_numbers<[1], [0], [0], [1], [0, 0, 1, 1], [], []>} : vector<16x128xbf16>, vector<128x128xbf16>, vector<16x128xf32> -> vector<16x128xf32>
    %c1_11 = arith.constant 1 : index
    %c0_12 = arith.constant 0 : index
    %c0_13 = arith.constant 0 : index
    %14 = vector.load %arg3[%c1_11, %c0_12, %c0_13] : memref<3x1x128xf32, #tpu.memory_space<vmem>>, vector<1x1x128xf32>
    %15 = vector.shape_cast %14 : vector<1x1x128xf32> to vector<1x128xf32>
    %16 = vector.broadcast %15 : vector<1x128xf32> to vector<16x128xf32>
    %17 = arith.addf %13, %16 : vector<16x128xf32>
    %cst_14 = arith.constant 0.000000e+00 : f32
    %18 = vector.broadcast %cst_14 : f32 to vector<16x128xf32>
    %19 = arith.maximumf %17, %18 : vector<16x128xf32>
    %20 = arith.truncf %19 : vector<16x128xf32> to vector<16x128xbf16>
    %c2 = arith.constant 2 : index
    %c0_15 = arith.constant 0 : index
    %c0_16 = arith.constant 0 : index
    %21 = vector.load %arg2[%c2, %c0_15, %c0_16] : memref<3x128x128xbf16, #tpu.memory_space<vmem>>, vector<1x128x128xbf16>
    %22 = vector.shape_cast %21 : vector<1x128x128xbf16> to vector<128x128xbf16>
    %cst_17 = arith.constant dense<0.000000e+00> : vector<16x128xf32>
    %23 = tpu.matmul %20, %22, %cst_17 {dimension_numbers = #tpu.dot_dimension_numbers<[1], [0], [0], [1], [0, 0, 1, 1], [], []>} : vector<16x128xbf16>, vector<128x128xbf16>, vector<16x128xf32> -> vector<16x128xf32>
    %c2_18 = arith.constant 2 : index
    %c0_19 = arith.constant 0 : index
    %c0_20 = arith.constant 0 : index
    %24 = vector.load %arg3[%c2_18, %c0_19, %c0_20] : memref<3x1x128xf32, #tpu.memory_space<vmem>>, vector<1x1x128xf32>
    %25 = vector.shape_cast %24 : vector<1x1x128xf32> to vector<1x128xf32>
    %26 = vector.broadcast %25 : vector<1x128xf32> to vector<16x128xf32>
    %27 = arith.addf %23, %26 : vector<16x128xf32>
    %cst_21 = arith.constant 0.000000e+00 : f32
    %28 = vector.broadcast %cst_21 : f32 to vector<16x128xf32>
    %29 = arith.maximumf %27, %28 : vector<16x128xf32>
    %c0_22 = arith.constant 0 : index
    %c0_23 = arith.constant 0 : index
    %30 = vector.load %arg4[%c0_22, %c0_23] : memref<16x128xf32, #tpu.memory_space<vmem>>, vector<16x128xf32>
    tpu.vector_store %arg4[%c0_22, %c0_23], %29 {strides = array<i32>} : memref<16x128xf32, #tpu.memory_space<vmem>>, vector<16x128xf32>,
    return
  }
  func.func @transform_0(%arg0: i32) -> (i32, i32) {
    %c0_i32 = arith.constant 0 : i32
    %c0_i32_0 = arith.constant 0 : i32
    return %arg0, %c0_i32 : i32, i32
  }
  func.func @transform_1(%arg0: i32) -> (i32, i32, i32) {
    %c0_i32 = arith.constant 0 : i32
    %c0_i32_0 = arith.constant 0 : i32
    %c0_i32_1 = arith.constant 0 : i32
    %c0_i32_2 = arith.constant 0 : i32
    return %c0_i32, %c0_i32_0, %c0_i32_1 : i32, i32, i32
  }
  func.func @transform_2(%arg0: i32) -> (i32, i32, i32) {
    %c0_i32 = arith.constant 0 : i32
    %c0_i32_0 = arith.constant 0 : i32
    %c0_i32_1 = arith.constant 0 : i32
    %c0_i32_2 = arith.constant 0 : i32
    return %c0_i32, %c0_i32_0, %c0_i32_1 : i32, i32, i32
  }
  func.func @transform_3(%arg0: i32) -> (i32, i32) {
    %c0_i32 = arith.constant 0 : i32
    %c0_i32_0 = arith.constant 0 : i32
    return %arg0, %c0_i32 : i32, i32
  }
}

</mosaic_0001>

<bundles_post_ra>
// kernel: tpu_custom_call.1
= control target key start
LH: loop header
LB: loop body
LE: loop exit
PB: predicated region body
PF: predicated region fallthrough
CT: control target
= control target key end

     0   :  { %8 = vsyncpa [#allocation3], 0  ;;  %s747_s0 = inlined_call_operand.hbm [shape: bf16[16,128], index: 0, kind: input, shape index: {}]   ;;  %s748_s1 = inlined_call_operand.hbm [shape: bf16[3,128,128], index: 1, kind: input, shape index: {}]   ;;  %s749_s2 = inlined_call_operand.vmem [shape: f32[3,1,128], index: 2, kind: input, shape index: {}]   ;;  %s750_s3 = inlined_call_operand.hbm [shape: f32[16,128], index: 3, kind: output, shape index: {}]  }
   0x1   :  { %9 = vsyncpa [#allocation6], 0 }
   0x2   :  { %10 = vsyncpa [#allocation4], 0  ;;  %s643_s12 = smov [#allocation2]   ;;  %s571_s16 = scalar_lea.hbm %s747_s0, 128 }
   0x3   :  { %s16_s13 = sshll.u32 %s643_s12, 4  ;;  %p572_p0 = scmp.ne.s32.totalorder %s747_s0, %s571_s16  ;;  %s17_s13 = int_to_ptr.vmem [resolvable:$true] %s16_s13 }
   0x4   :  { %p575_p1 = scmp.lt.u32.totalorder %s571_s16, %s747_s0 }
   0x6   :  { %p577_p2 = pnand %p575_p1, %p572_p0 }
   0x8   :  { %580 = shalt.err (!%p577_p2)
}
   0x9   :  { %s581_s21 = scalar_lea.vmem %s17_s13, 128  ;;  %p586_p4 = scmp.lt.s32.totalorder %s17_s13, %s17_s13 }
   0xa   :  { %p582_p3 = scmp.ne.s32.totalorder %s17_s13, %s581_s21  ;;  %p587_p5 = scmp.lt.s32.totalorder %s581_s21, %s581_s21 }
   0xc   :  { %p588_p6 = por %p587_p5, %p586_p4 }
   0xe   :  { %p589_p7 = pnand %p588_p6, %p582_p3 }
  0x10   :  { %592 = shalt.err (!%p589_p7)
}
  0x11   :  { %s644_s22 = smov 64   ;;  %s645_s23 = smov 4  }
  0x12   :  { %22 = dma.hbm_to_vmem [thread:$0]  %s747_s0, 128, %s17_s13, [#allocation3], %s644_s22, %s644_s22, %s645_s23  }
  0x13   :  { %s646_s26 = smov [#allocation5]   ;;  %s593_s30 = scalar_lea.hbm %s748_s1, 3072 }
  0x14   :  { %s28_s27 = sshll.u32 %s646_s26, 4  ;;  %p594_p8 = scmp.ne.s32.totalorder %s748_s1, %s593_s30  ;;  %s29_s27 = int_to_ptr.vmem [resolvable:$true] %s28_s27 }
  0x15   :  { %p597_p9 = scmp.lt.u32.totalorder %s593_s30, %s748_s1 }
  0x17   :  { %p599_p10 = pnand %p597_p9, %p594_p8 }
  0x19   :  { %602 = shalt.err (!%p599_p10)
}
  0x1a   :  { %s603_s8 = scalar_lea.vmem %s29_s27, 3072  ;;  %p608_p12 = scmp.lt.s32.totalorder %s29_s27, %s29_s27 }
  0x1b   :  { %p604_p11 = scmp.ne.s32.totalorder %s29_s27, %s603_s8  ;;  %p609_p13 = scmp.lt.s32.totalorder %s603_s8, %s603_s8 }
  0x1d   :  { %p610_p0 = por %p609_p13, %p608_p12 }
  0x1f   :  { %p611_p1 = pnand %p610_p0, %p604_p11 }
  0x21   :  { %614 = shalt.err (!%p611_p1)
}
  0x22   :  { %34 = dma.hbm_to_vmem [thread:$0]  %s748_s1, 3072, %s29_s27, [#allocation6], %s644_s22, %s644_s22, %s645_s23  }
  0x23   :  { %637 = dma.done.wait [#allocation3], 128  }
  0x24   :  { %638 = vsyncadd [#allocation3], 4294967168 }
  0x25   :  { %639 = dma.done.wait [#allocation6], 3072  }
  0x26   :  { %640 = vsyncadd [#allocation6], 4294964224  ;;  %v647_v0 = vmov 0.0   ;;  %vm648_vm0 = vmmov 0   ;;  %v546_v1 = vld [vmem:[#allocation5] sm:$0xff]   ;;  %v547_v2 = vld [vmem:[#allocation5 + $0x8] sm:$0xff]  }
  0x27   :  { %477 = vmatprep.subr.bf16.mxu0 %v647_v0  ;;  %493 = vmatprep.mubr.msk.bf16.mxu0 %vm648_vm0, %v647_v0  ;;  %v548_v3 = vld [vmem:[#allocation5 + $0x10] sm:$0xff]   ;;  %v555_v4 = vld [vmem:[#allocation5 + $0x40] sm:$0xff]   ;;  %v549_v5 = vld [vmem:[#allocation5 + $0x18] sm:$0xff]   ;;  %s649_s15 = smov [#allocation7]  }
  0x28   :  { %497 = vmatprep.subr.bf16.mxu1 %v647_v0  ;;  %513 = vmatprep.mubr.msk.bf16.mxu1 %vm648_vm0, %v647_v0  ;;  %v556_v6 = vld [vmem:[#allocation5 + $0x48] sm:$0xff]   ;;  %v550_v7 = vld [vmem:[#allocation5 + $0x20] sm:$0xff]   ;;  %v557_v8 = vld [vmem:[#allocation5 + $0x50] sm:$0xff]   ;;  %s407_s16 = sshll.u32 %s649_s15, 4  ;;  %s408_s16 = int_to_ptr.vmem [resolvable:$true] %s407_s16 }
  0x29   :  { %478 = vmatpush3.bf16.msra.mxu0 %v546_v1  ;;  %498 = vmatpush3.bf16.msra.mxu1 %v555_v4  ;;  %v551_v9 = vld [vmem:[#allocation5 + $0x28] sm:$0xff]   ;;  %v558_v10 = vld [vmem:[#allocation5 + $0x58] sm:$0xff]   ;;  %v552_v11 = vld [vmem:[#allocation5 + $0x30] sm:$0xff]   ;;  %s615_s17 = scalar_lea.vmem %s408_s16, 256  ;;  %p620_p3 = scmp.lt.s32.totalorder %s408_s16, %s408_s16 }
  0x2a   :  { %479 = vmatprep.subr.bf16.mxu0 %v647_v0  ;;  %499 = vmatprep.subr.bf16.mxu1 %v647_v0  ;;  %v559_v12 = vld [vmem:[#allocation5 + $0x60] sm:$0xff]   ;;  %v553_v13 = vld [vmem:[#allocation5 + $0x38] sm:$0xff]   ;;  %v560_v14 = vld [vmem:[#allocation5 + $0x68] sm:$0xff]   ;;  %p616_p2 = scmp.ne.s32.totalorder %s408_s16, %s615_s17  ;;  %p621_p4 = scmp.lt.s32.totalorder %s615_s17, %s615_s17 }
  0x2b   :  { %v554_v15 = vld [vmem:[#allocation2] sm:$0xff]   ;;  %v561_v16 = vld [vmem:[#allocation5 + $0x70] sm:$0xff]   ;;  %v563_v18 = vld [vmem:[#allocation5 + $0x80] sm:$0xff]  }
  0x2c   :  { %v562_v17 = vld [vmem:[#allocation5 + $0x78] sm:$0xff]   ;;  %v564_v19 = vld [vmem:[#allocation5 + $0x88] sm:$0xff]   ;;  %v565_v20 = vld [vmem:[#allocation5 + $0x90] sm:$0xff]   ;;  %p622_p5 = por %p621_p4, %p620_p3 }
  0x2d   :  { %480 = vmatpush3.bf16.msra.mxu0 %v547_v2  ;;  %500 = vmatpush3.bf16.msra.mxu1 %v556_v6  ;;  %v566_v21 = vld [vmem:[#allocation5 + $0x98] sm:$0xff]   ;;  %v567_v22 = vld [vmem:[#allocation5 + $0xa0] sm:$0xff]   ;;  %v568_v23 = vld [vmem:[#allocation5 + $0xa8] sm:$0xff]  }
  0x2e   :  { %481 = vmatprep.subr.bf16.mxu0 %v647_v0  ;;  %501 = vmatprep.subr.bf16.mxu1 %v647_v0  ;;  %v420_v24 = vld [vmem:[%s749_s2] ss:$0 sm:$0xff]  ;;  %v569_v34 = vld [vmem:[#allocation5 + $0xb0] sm:$0xff]   ;;  %v431_v36 = vld [vmem:[%s749_s2 + $0x1] ss:$0 sm:$0xff]  ;;  %p623_p6 = pnand %p622_p5, %p616_p2 }
  0x2f   :  { %v570_v35 = vld [vmem:[#allocation5 + $0xb8] sm:$0xff]  }
  0x30   :  { %v441_v46 = vld [vmem:[%s749_s2 + $0x2] ss:$0 sm:$0xff] }
  0x31   :  { %482 = vmatpush3.bf16.msra.mxu0 %v548_v3  ;;  %502 = vmatpush3.bf16.msra.mxu1 %v557_v8 }
  0x32   :  { %483 = vmatprep.subr.bf16.mxu0 %v647_v0  ;;  %503 = vmatprep.subr.bf16.mxu1 %v647_v0 }
  0x35   :  { %484 = vmatpush3.bf16.msra.mxu0 %v549_v5  ;;  %504 = vmatpush3.bf16.msra.mxu1 %v558_v10 }
  0x36   :  { %485 = vmatprep.subr.bf16.mxu0 %v647_v0  ;;  %505 = vmatprep.subr.bf16.mxu1 %v647_v0 }
  0x39   :  { %486 = vmatpush3.bf16.msra.mxu0 %v550_v7  ;;  %506 = vmatpush3.bf16.msra.mxu1 %v559_v12 }
  0x3a   :  { %487 = vmatprep.subr.bf16.mxu0 %v647_v0  ;;  %507 = vmatprep.subr.bf16.mxu1 %v647_v0 }
  0x3d   :  { %488 = vmatpush3.bf16.msra.mxu0 %v551_v9  ;;  %508 = vmatpush3.bf16.msra.mxu1 %v560_v14 }
  0x3e   :  { %489 = vmatprep.subr.bf16.mxu0 %v647_v0  ;;  %509 = vmatprep.subr.bf16.mxu1 %v647_v0 }
  0x41   :  { %490 = vmatpush3.bf16.msra.mxu0 %v552_v11  ;;  %510 = vmatpush3.bf16.msra.mxu1 %v561_v16 }
  0x42   :  { %491 = vmatprep.subr.bf16.mxu0 %v647_v0  ;;  %511 = vmatprep.subr.bf16.mxu1 %v647_v0 }
  0x45   :  { %492 = vmatpush3.bf16.msra.mxu0 %v553_v13  ;;  %512 = vmatpush3.bf16.msra.mxu1 %v562_v17 }
  0x46   :  { %517 = vmatprep.subr.bf16.mxu0 %v647_v0 }
  0x48   :  { %494 = vmatmul.mubr.bf16.vlgmr.msra.gmra.mrb[0].mxu0 %v554_v15 }
  0x49   :  { %533 = vmatprep.mubr.msk.bf16.mxu0 %vm648_vm0, %v647_v0  ;;  %518 = vmatpush3.bf16.msra.mxu0 %v563_v18 }
  0x4a   :  { %519 = vmatprep.subr.bf16.mxu0 %v647_v0 }
  0x4d   :  { %520 = vmatpush3.bf16.msra.mxu0 %v564_v19 }
  0x4e   :  { %521 = vmatprep.subr.bf16.mxu0 %v647_v0 }
  0x51   :  { %522 = vmatpush3.bf16.msra.mxu0 %v565_v20 }
  0x52   :  { %523 = vmatprep.subr.bf16.mxu0 %v647_v0 }
  0x55   :  { %524 = vmatpush3.bf16.msra.mxu0 %v566_v21 }
  0x56   :  { %525 = vmatprep.subr.bf16.mxu0 %v647_v0 }
  0x59   :  { %526 = vmatpush3.bf16.msra.mxu0 %v567_v22 }
  0x5a   :  { %527 = vmatprep.subr.bf16.mxu0 %v647_v0 }
  0x5d   :  { %528 = vmatpush3.bf16.msra.mxu0 %v568_v23 }
  0x5e   :  { %529 = vmatprep.subr.bf16.mxu0 %v647_v0 }
  0x61   :  { %530 = vmatpush3.bf16.msra.mxu0 %v569_v34 }
  0x62   :  { %531 = vmatprep.subr.bf16.mxu0 %v647_v0 }
  0x65   :  { %532 = vmatpush3.bf16.msra.mxu0 %v570_v35 }
 0x11b   :  { %v157_v25 = vpop.f32.mrb[0].mxu0 }
 0x11c   :  { %v158_v26 = vadd.f32 %v420_v24, %v157_v25  ;;  %v495_v27 = vpop.f32.mrb[1].mxu0 }
 0x11d   :  { %v160_v28 = vpop.f32.mrb[2].mxu0 }
 0x11e   :  { %v161_v29 = vadd.f32 %v420_v24, %v160_v28  ;;  %v496_v30 = vpop.f32.mrb[3].mxu0  ;;  %v164_v31 = vmax.f32 %v158_v26, 0.0 }
 0x120   :  { %v165_v32 = vmax.f32 %v161_v29, 0.0 }
 0x122   :  { %v166_v33 = vpack.c.bf16 %v165_v32, %v164_v31 }
 0x124   :  { %514 = vmatmul.mubr.bf16.vlgmr.msra.gmra.mrb[0].mxu1 %v166_v33 }
 0x1f7   :  { %v274_v37 = vpop.f32.mrb[0].mxu1 }
 0x1f8   :  { %v275_v38 = vadd.f32 %v431_v36, %v274_v37  ;;  %v515_v39 = vpop.f32.mrb[1].mxu1 }
 0x1f9   :  { %v277_v40 = vpop.f32.mrb[2].mxu1 }
 0x1fa   :  { %v278_v41 = vadd.f32 %v431_v36, %v277_v40  ;;  %v516_v42 = vpop.f32.mrb[3].mxu1  ;;  %v281_v43 = vmax.f32 %v275_v38, 0.0 }
 0x1fc   :  { %v282_v44 = vmax.f32 %v278_v41, 0.0 }
 0x1fe   :  { %v283_v45 = vpack.c.bf16 %v282_v44, %v281_v43 }
 0x200   :  { %534 = vmatmul.mubr.bf16.vlgmr.msra.gmra.mrb[4].mxu0 %v283_v45 }
 0x2d3   :  { %v391_v47 = vpop.f32.mrb[4].mxu0 }
 0x2d4   :  { %v392_v48 = vadd.f32 %v441_v46, %v391_v47  ;;  %v535_v49 = vpop.f32.mrb[5].mxu0 }
 0x2d5   :  { %v394_v50 = vpop.f32.mrb[6].mxu0 }
 0x2d6   :  { %v398_v51 = vmax.f32 %v392_v48, 0.0  ;;  %v395_v52 = vadd.f32 %v441_v46, %v394_v50  ;;  %v536_v53 = vpop.f32.mrb[7].mxu0 }
 0x2d8   :  { %400 = vst [vmem:[#allocation7] sm:$0xff] %v398_v51  ;;  %v399_v54 = vmax.f32 %v395_v52, 0.0 }
 0x2da   :  { %401 = vst [vmem:[#allocation7 + $0x8] sm:$0xff] %v399_v54 }
 0x2db   :  { %626 = shalt.err (!%p623_p6)
}
 0x2dc   :  { %s627_s19 = scalar_lea.hbm %s750_s3, 256 }
 0x2dd   :  { %p628_p7 = scmp.ne.s32.totalorder %s750_s3, %s627_s19  ;;  %p631_p8 = scmp.lt.u32.totalorder %s627_s19, %s750_s3 }
 0x2df   :  { %p633_p9 = pnand %p631_p8, %p628_p7 }
 0x2e1   :  { %636 = shalt.err (!%p633_p9)
}
 0x2e2   :  { %s650_s24 = smov 128   ;;  %s651_s25 = smov 8  }
 0x2e3   :  { %413 = dma.vmem_to_hbm [thread:$0]  %s408_s16, 256, %s750_s3, [#allocation4], %s650_s24, %s650_s24, %s651_s25  }
 0x2e4   :  { %641 = dma.done.wait [#allocation4], 256  }
 0x2e5   :  { %642 = vsyncadd [#allocation4], 4294967040 }
 0x2e6   :  { %417 = vsyncpa [#allocation3], 1 }
 0x2e7   :  { %418 = vsyncpa [#allocation6], 1 }
 0x2e8   :  { %419 = vsyncpa [#allocation4], 1 }

</bundles_post_ra>
